<compile_context>
chip_gen: v6e
topology: v6e:2x2x1
jax: 0.10.0
libtpu: 0.0.40
codegen_flags: <defaults>
</compile_context>

<pallas_src>
import jax
import jax.numpy as jnp
from jax.experimental import pallas as pl
from jax.experimental.pallas import tpu as pltpu

_HP = jax.lax.Precision.HIGHEST


def _round_up(x, m):
    return ((x + m - 1) // m) * m


def _vpu_supports_bf16():
    """bf16 VPU taps are a win on v6e/v7x; v5e and older lack a bf16 VPU."""
    try:
        kind = jax.devices()[0].device_kind.lower()
    except Exception:
        return False
    return not any(v in kind for v in ("v2", "v3", "v4", "v5"))


# ----------------------------- 1x1 conv kernel ------------------------------

def _pointwise_kernel(x_ref, w_ref, b_ref, o_ref):
    # bf16 operands on the MXU (weights already bf16 in HBM), f32 accumulation.
    o_ref[...] = (jnp.dot(x_ref[...].astype(jnp.bfloat16), w_ref[...],
                          preferred_element_type=jnp.float32)
                  + b_ref[...]).astype(o_ref.dtype)


def pointwise_conv(x2d, w, b, *, tile_m=1024):
    """1x1 convolution == per-token matmul. x2d: (M, Cin) -> (M, Cout)."""
    M, Cin = x2d.shape
    Cout = w.shape[1]
    tm = min(tile_m, _round_up(M, 8))           # big tiles amortize grid overhead
    # v7x has 2 TensorCores: keep at least 2 "parallel" grid steps when possible
    # (also keeps per-tile VMEM well under v7x's smaller scoped budget).
    if _round_up(M, tm) // tm < 2 and M > 8:
        tm = _round_up((M + 1) // 2, 8)
    Mp = _round_up(M, tm)
    xp = x2d if Mp == M else jnp.pad(x2d, ((0, Mp - M), (0, 0)))
    w_bf = w.astype(jnp.bfloat16)               # halve weight HBM traffic
    out = pl.pallas_call(
        _pointwise_kernel,
        out_shape=jax.ShapeDtypeStruct((Mp, Cout), x2d.dtype),
        grid=(Mp // tm,),
        in_specs=[
            pl.BlockSpec((tm, Cin), lambda i: (i, 0)),
            pl.BlockSpec((Cin, Cout), lambda i: (0, 0)),
            pl.BlockSpec((1, Cout), lambda i: (0, 0)),
        ],
        out_specs=pl.BlockSpec((tm, Cout), lambda i: (i, 0)),
        compiler_params=pltpu.CompilerParams(
            dimension_semantics=("parallel",),
            vmem_limit_bytes=32 * 1024 * 1024),
    )(xp, w_bf, b)
    return out if Mp == M else out[:M]


# -------------------------- depthwise 3x3 (LePE) -----------------------------

def _make_dwconv_kernel(H, W, KS, row_chunk, tap_dtype):
    pad = KS // 2

    def kernel(x_ref, w_ref, b_ref, o_ref):
        ct = o_ref.shape[-1]
        w = w_ref[...].astype(tap_dtype)              # (KS, KS, ct)
        bias = b_ref[...].astype(jnp.float32)         # (1, ct)
        # Row-chunked accumulator: keeps acc and the shifted input slices in
        # registers instead of spilling a full (H, W, ct) f32 image per tap.
        for r0 in range(0, H, row_chunk):
            acc = jnp.zeros((row_chunk, W, ct), jnp.float32)
            for dw_off in range(KS):
                # one sublane (column) shift per kernel column per chunk;
                # row offsets are cheap major-dim slices.
                xw = x_ref[r0:r0 + row_chunk + 2 * pad,
                           dw_off:dw_off + W, :].astype(tap_dtype)
                for dh in range(KS):
                    acc = acc + xw[dh:dh + row_chunk] * w[dh, dw_off]
            o_ref[r0:r0 + row_chunk, :, :] = (acc + bias).astype(o_ref.dtype)

    return kernel


def depthwise_conv(x_nhwc, w, b, *, tap_dtype=jnp.float32, row_chunk=8):
    """Depthwise KxK conv (LePE). x_nhwc: (N,H,W,C), w: (K,K,C), b: (1,C)."""
    N, H, W, C = x_nhwc.shape
    KS = w.shape[0]
    pad = KS // 2
    xp = jnp.pad(x_nhwc, ((0, 0), (pad, pad), (pad, pad), (0, 0)))
    ct = 128 if C % 128 == 0 else C               # tile channels on the lane axis
    rc = min(row_chunk, H)
    while H % rc:                                 # largest chunk dividing H
        rc -= 1
    # TODO(synk): for very large H*W also tile the input rows across the grid
    # (halo blocks); here the full padded image per (n, c-block) stays in VMEM.
    return pl.pallas_call(
        _make_dwconv_kernel(H, W, KS, rc, tap_dtype),
        out_shape=jax.ShapeDtypeStruct((N, H, W, C), x_nhwc.dtype),
        grid=(N, C // ct),
        in_specs=[
            pl.BlockSpec((None, H + 2 * pad, W + 2 * pad, ct),
                         lambda n, c: (n, 0, 0, c)),
            pl.BlockSpec((KS, KS, ct), lambda n, c: (0, 0, c)),
            pl.BlockSpec((1, ct), lambda n, c: (0, c)),
        ],
        out_specs=pl.BlockSpec((None, H, W, ct), lambda n, c: (n, 0, 0, c)),
        compiler_params=pltpu.CompilerParams(
            dimension_semantics=("parallel", "parallel"),
            vmem_limit_bytes=32 * 1024 * 1024),
    )(xp, w, b)


# ----------------------- regional top-k attention ---------------------------
#
# q/k/v arrive pre-split by head: (N, nregion, num_heads, rt, head_dim).
# grid = (N, nregion); topk is an unrolled in-kernel loop with manual
# double-buffered DMA of the routed K/V regions (pl.ANY HBM refs). m/l/acc are
# loop-carried values; all heads update in one batched einsum per region.

def _make_attn_kernel(nregion, topk, num_heads, rt, head_dim, compute_dtype):
    def kernel(idx_ref, q_ref, k_hbm, v_hbm, o_ref, kbuf, vbuf, sem):
        n = pl.program_id(0)
        r = pl.program_id(1)
        base = (n * nregion + r) * topk

        def start_fetch(t, slot):
            rid = idx_ref[base + t]
            pltpu.make_async_copy(k_hbm.at[n, rid], kbuf.at[slot],
                                  sem.at[0, slot]).start()
            pltpu.make_async_copy(v_hbm.at[n, rid], vbuf.at[slot],
                                  sem.at[1, slot]).start()

        def wait_fetch(slot):
            pltpu.make_async_copy(k_hbm.at[n, 0], kbuf.at[slot],
                                  sem.at[0, slot]).wait()
            pltpu.make_async_copy(v_hbm.at[n, 0], vbuf.at[slot],
                                  sem.at[1, slot]).wait()

        start_fetch(0, 0)

        # q scale is pre-folded into the qkv weights; q is already head-split.
        qh = q_ref[...]                                       # (H, rt, D) bf16

        m = jnp.full((num_heads, rt, 1), -jnp.inf, jnp.float32)
        l = jnp.zeros((num_heads, rt, 1), jnp.float32)
        acc = jnp.zeros((num_heads, rt, head_dim), jnp.float32)

        for t in range(topk):                  # static, small; carries in vregs
            slot = t & 1
            wait_fetch(slot)
            if t + 1 < topk:
                start_fetch(t + 1, 1 - slot)   # prefetch next routed region
            kh = kbuf[slot]                                   # (H, rt, D)
            vh = vbuf[slot]
            s = jnp.einsum('hqd,hkd->hqk', qh, kh,
                           preferred_element_type=jnp.float32)  # (H, rt, rt)
            m_new = jnp.maximum(m, jnp.max(s, axis=-1, keepdims=True))
            alpha = jnp.exp(m - m_new)
            p = jnp.exp(s - m_new)
            l = alpha * l + jnp.sum(p, axis=-1, keepdims=True)
            acc = alpha * acc + jnp.einsum('hqk,hkd->hqd',
                                           p.astype(compute_dtype), vh,
                                           preferred_element_type=jnp.float32)
            m = m_new

        out = acc * pl.reciprocal(l, approx=True)
        o_ref[...] = out.astype(o_ref.dtype)   # single store of the block

    return kernel


def regional_attention(q_seq, k_seq, v_seq, idx_flat, topk,
                       compute_dtype=jnp.bfloat16):
    """q/k/v_seq: (N, nregion, num_heads, rt, head_dim); idx_flat: (N*nr*topk,)."""
    N, nregion, num_heads, rt, head_dim = q_seq.shape
    # Operands are only ever used as bf16 MXU inputs -> store them bf16 so the
    # gather DMAs move half the bytes.
    q_seq = q_seq.astype(compute_dtype)
    k_seq = k_seq.astype(compute_dtype)
    v_seq = v_seq.astype(compute_dtype)

    def q_map(n, r, idx):
        return (n, r, 0, 0, 0)

    grid_spec = pltpu.PrefetchScalarGridSpec(
        num_scalar_prefetch=1,
        grid=(N, nregion),
        in_specs=[
            pl.BlockSpec((None, None, num_heads, rt, head_dim), q_map),
            pl.BlockSpec(memory_space=pl.ANY),   # k: raw HBM, manual DMA gather
            pl.BlockSpec(memory_space=pl.ANY),   # v: raw HBM, manual DMA gather
        ],
        out_specs=pl.BlockSpec((None, None, num_heads, rt, head_dim), q_map),
        scratch_shapes=[
            pltpu.VMEM((2, num_heads, rt, head_dim), compute_dtype),  # k dbuf
            pltpu.VMEM((2, num_heads, rt, head_dim), compute_dtype),  # v dbuf
            pltpu.SemaphoreType.DMA((2, 2)),
        ],
    )
    return pl.pallas_call(
        _make_attn_kernel(nregion, topk, num_heads, rt, head_dim, compute_dtype),
        out_shape=jax.ShapeDtypeStruct((N, nregion, num_heads, rt, head_dim),
                                       jnp.float32),
        grid_spec=grid_spec,
        compiler_params=pltpu.CompilerParams(
            dimension_semantics=("parallel", "parallel")),
    )(idx_flat, q_seq, k_seq, v_seq)


# ------------------------ pure-JAX reference backend ------------------------
# The references mirror the kernels' low-precision operand rounding (bf16 MXU
# operands / bf16 taps when enabled, f32 accumulation at HIGHEST precision) so
# the comparison isolates kernel bugs rather than dtype rounding.

def _bf16_round(x):
    return x.astype(jnp.bfloat16).astype(jnp.float32)


def pointwise_conv_ref(x2d, w, b):
    return jnp.dot(_bf16_round(x2d), _bf16_round(w), precision=_HP) + b


def depthwise_conv_ref(x_nhwc, w, b, *, tap_dtype=jnp.float32):
    N, H, W, C = x_nhwc.shape
    KS = w.shape[0]
    pad = KS // 2
    xp = jnp.pad(x_nhwc, ((0, 0), (pad, pad), (pad, pad), (0, 0))).astype(tap_dtype)
    wt = w.astype(tap_dtype)
    acc = jnp.zeros((N, H, W, C), jnp.float32)
    for dh in range(KS):
        for dw_ in range(KS):
            acc = acc + (xp[:, dh:dh + H, dw_:dw_ + W, :] * wt[dh, dw_]
                         ).astype(jnp.float32)
    return acc + b


def regional_attention_ref(q_seq, k_seq, v_seq, idx, topk, num_heads):
    """q/k/v_seq: (N, nr, H, rt, D); idx: (N, nr, topk)."""
    N, nr, Hh, rt, D = q_seq.shape
    b = jnp.arange(N)[:, None, None]
    kg = k_seq[b, idx]                                   # (N, nr, topk, H, rt, D)
    vg = v_seq[b, idx]
    kg = kg.transpose(0, 1, 3, 2, 4, 5).reshape(N, nr, Hh, topk * rt, D)
    vg = vg.transpose(0, 1, 3, 2, 4, 5).reshape(N, nr, Hh, topk * rt, D)
    s = jnp.einsum('bnhqd,bnhkd->bnhqk',
                   _bf16_round(q_seq), _bf16_round(kg), precision=_HP)
    p = jax.nn.softmax(s, axis=-1)
    o = jnp.einsum('bnhqk,bnhkd->bnhqd',
                   _bf16_round(p), _bf16_round(vg), precision=_HP)
    return o                                             # (N, nr, H, rt, D)


# ------------------------------ forward pass ---------------------------------

def bilevel_routing_attention_forward(x, params, num_heads, n_win, topk,
                                      use_pallas=True):
    """x: (N, C, H, W) float32 -> (N, C, H, W) float32.

    Matches BiLevelRoutingAttention defaults: qk_dim == dim, identity
    kv_downsample, param_attention='qkvo', no param/diff/soft routing.
    """
    N, C, H, W = x.shape
    assert C % num_heads == 0
    # TODO(synk): auto_pad branch (H/W not multiples of n_win) not implemented.
    assert H % n_win == 0 and W % n_win == 0
    rs_h, rs_w = H // n_win, W // n_win
    nregion = n_win * n_win
    rt = rs_h * rs_w
    head_dim = C // num_heads
    scale = float(C) ** (-0.5)           # qk_dim ** -0.5 with qk_dim == dim
    tap_dtype = jnp.bfloat16 if _vpu_supports_bf16() else jnp.float32

    # Fold the q-scale into the q columns of the qkv projection (free; the
    # routing top-k is invariant to a positive scale, attention needs q*scale).
    col_scale = jnp.concatenate(
        [jnp.full((C,), scale, params['w_qkv'].dtype),
         jnp.ones((2 * C,), params['w_qkv'].dtype)])
    w_qkv = params['w_qkv'] * col_scale
    b_qkv = params['b_qkv'] * col_scale

    x_nhwc = jnp.transpose(x, (0, 2, 3, 1))
    M = N * H * W

    # qkv 1x1 conv
    if use_pallas:
        qkv = pointwise_conv(x_nhwc.reshape(M, C), w_qkv, b_qkv)
    else:
        qkv = pointwise_conv_ref(x_nhwc.reshape(M, C), w_qkv, b_qkv)
    qkv = qkv.reshape(N, H, W, 3 * C)
    q, k, v = qkv[..., :C], qkv[..., C:2 * C], qkv[..., 2 * C:]

    # region-level routing (avg-pool + small affinity matmul + top-k) in JAX
    def region_mean(t):
        t = t.reshape(N, n_win, rs_h, n_win, rs_w, C)
        return t.mean(axis=(2, 4)).reshape(N, nregion, C)

    q_r, k_r = region_mean(q), region_mean(k)
    a_r = jnp.einsum('bic,bjc->bij', q_r, k_r, precision=_HP)
    _, idx_r = jax.lax.top_k(a_r, topk)                  # (N, nregion, topk)
    idx_r = idx_r.astype(jnp.int32)

    # NHWC -> (N, nregion, num_heads, rt, head_dim): single layout pass, no
    # further in-kernel relayouts (channel axis split head-major).
    def to_regions(t):
        t = t.reshape(N, n_win, rs_h, n_win, rs_w, num_heads, head_dim)
        t = jnp.transpose(t, (0, 1, 3, 5, 2, 4, 6))
        return t.reshape(N, nregion, num_heads, rt, head_dim)

    q_seq, k_seq, v_seq = to_regions(q), to_regions(k), to_regions(v)

    if use_pallas:
        o_seq = regional_attention(q_seq, k_seq, v_seq, idx_r.reshape(-1), topk)
    else:
        o_seq = regional_attention_ref(q_seq, k_seq, v_seq, idx_r, topk,
                                       num_heads)

    # (N, nregion, num_heads, rt, head_dim) -> NHWC with head-major channels
    o = o_seq.reshape(N, n_win, n_win, num_heads, rs_h, rs_w, head_dim)
    o = jnp.transpose(o, (0, 1, 4, 2, 5, 3, 6)).reshape(N, H, W, C)

    # LePE depthwise conv on v, residual add, output 1x1 conv
    if use_pallas:
        lepe = depthwise_conv(v, params['w_lepe'], params['b_lepe'],
                              tap_dtype=tap_dtype)
    else:
        lepe = depthwise_conv_ref(v, params['w_lepe'], params['b_lepe'],
                                  tap_dtype=tap_dtype)
    o = o + lepe

    if use_pallas:
        out = pointwise_conv(o.reshape(M, C), params['w_out'], params['b_out'])
    else:
        out = pointwise_conv_ref(o.reshape(M, C), params['w_out'],
                                 params['b_out'])
    out = out.reshape(N, H, W, C)
    return jnp.transpose(out, (0, 3, 1, 2))


# ---------------------------------- main -------------------------------------

if __name__ == "__main__":
    N, C, H, W = 2, 16, 16, 16
    num_heads, n_win, topk = 4, 4, 4

    key = jax.random.PRNGKey(0)
    ks = jax.random.split(key, 8)
    params = {
        'w_qkv': 0.2 * jax.random.normal(ks[0], (C, 3 * C), jnp.float32),
        'b_qkv': 0.1 * jax.random.normal(ks[1], (1, 3 * C), jnp.float32),
        'w_lepe': 0.2 * jax.random.normal(ks[2], (3, 3, C), jnp.float32),
        'b_lepe': 0.1 * jax.random.normal(ks[3], (1, C), jnp.float32),
        'w_out': 0.2 * jax.random.normal(ks[4], (C, C), jnp.float32),
        'b_out': 0.1 * jax.random.normal(ks[5], (1, C), jnp.float32),
    }
    x = jax.random.normal(ks[6], (N, C, H, W), jnp.float32)

    out = bilevel_routing_attention_forward(x, params, num_heads, n_win, topk,
                                            use_pallas=True)
    out = jax.block_until_ready(out)

    ref = bilevel_routing_attention_forward(x, params, num_heads, n_win, topk,
                                            use_pallas=False)
    ref = jax.block_until_ready(ref)

    assert out.shape == (N, C, H, W)
    assert bool(jnp.all(jnp.isfinite(out)))
    max_err = float(jnp.max(jnp.abs(out - ref)))
    assert max_err < 2e-2, f"max abs err vs reference: {max_err}"
    print("KERNEL_OK")
</pallas_src>

<mosaic_0001>
module attributes {stable_mosaic.version = 11 : i64} {
  func.func @_pointwise_kernel(%arg0: i32, %arg1: memref<256x16xf32, #tpu.memory_space<vmem>>, %arg2: memref<16x48xbf16, #tpu.memory_space<vmem>>, %arg3: memref<1x48xf32, #tpu.memory_space<vmem>>, %arg4: memref<256x48xf32, #tpu.memory_space<vmem>>) attributes {dimension_semantics = [#tpu.dimension_semantics<parallel>], iteration_bounds = array<i64: 2>, scalar_prefetch = 0 : i64, scratch_operands = 0 : i64, tpu.core_type = #tpu.core_type<tc>, window_params = [{transform_indices = @transform_0, window_bounds = array<i64: 256, 16>}, {pipeline_mode = #tpu.pipeline_mode<synchronous>, transform_indices = @transform_1, window_bounds = array<i64: 16, 48>}, {pipeline_mode = #tpu.pipeline_mode<synchronous>, transform_indices = @transform_2, window_bounds = array<i64: 1, 48>}, {transform_indices = @transform_3, window_bounds = array<i64: 256, 48>}]} {
    %c0 = arith.constant 0 : index
    %c0_0 = arith.constant 0 : index
    %0 = vector.load %arg1[%c0, %c0_0] : memref<256x16xf32, #tpu.memory_space<vmem>>, vector<256x16xf32>
    %1 = arith.truncf %0 : vector<256x16xf32> to vector<256x16xbf16>
    %c0_1 = arith.constant 0 : index
    %c0_2 = arith.constant 0 : index
    %2 = vector.load %arg2[%c0_1, %c0_2] : memref<16x48xbf16, #tpu.memory_space<vmem>>, vector<16x48xbf16>
    %cst = arith.constant dense<0.000000e+00> : vector<256x48xf32>
    %3 = tpu.matmul %1, %2, %cst {dimension_numbers = #tpu.dot_dimension_numbers<[1], [0], [0], [1], [0, 0, 1, 1], [], []>} : vector<256x16xbf16>, vector<16x48xbf16>, vector<256x48xf32> -> vector<256x48xf32>
    %c0_3 = arith.constant 0 : index
    %c0_4 = arith.constant 0 : index
    %4 = vector.load %arg3[%c0_3, %c0_4] : memref<1x48xf32, #tpu.memory_space<vmem>>, vector<1x48xf32>
    %5 = vector.broadcast %4 : vector<1x48xf32> to vector<256x48xf32>
    %6 = arith.addf %3, %5 : vector<256x48xf32>
    %c0_5 = arith.constant 0 : index
    %c0_6 = arith.constant 0 : index
    %7 = vector.load %arg4[%c0_5, %c0_6] : memref<256x48xf32, #tpu.memory_space<vmem>>, vector<256x48xf32>
    tpu.vector_store %arg4[%c0_5, %c0_6], %6 {strides = array<i32>} : memref<256x48xf32, #tpu.memory_space<vmem>>, vector<256x48xf32>,
    return
  }
  func.func @transform_0(%arg0: i32) -> (i32, i32) {
    %c0_i32 = arith.constant 0 : i32
    %c0_i32_0 = arith.constant 0 : i32
    return %arg0, %c0_i32 : i32, i32
  }
  func.func @transform_1(%arg0: i32) -> (i32, i32) {
    %c0_i32 = arith.constant 0 : i32
    %c0_i32_0 = arith.constant 0 : i32
    %c0_i32_1 = arith.constant 0 : i32
    return %c0_i32, %c0_i32_0 : i32, i32
  }
  func.func @transform_2(%arg0: i32) -> (i32, i32) {
    %c0_i32 = arith.constant 0 : i32
    %c0_i32_0 = arith.constant 0 : i32
    %c0_i32_1 = arith.constant 0 : i32
    return %c0_i32, %c0_i32_0 : i32, i32
  }
  func.func @transform_3(%arg0: i32) -> (i32, i32) {
    %c0_i32 = arith.constant 0 : i32
    %c0_i32_0 = arith.constant 0 : i32
    return %arg0, %c0_i32 : i32, i32
  }
}

</mosaic_0001>

<bundles_post_ra>
// kernel: tpu_custom_call.1
= control target key start
LH: loop header
LB: loop body
LE: loop exit
PB: predicated region body
PF: predicated region fallthrough
CT: control target
= control target key end

     0   :  { %s656_s12 = smov 0   ;;  %s836_s0 = inlined_call_operand.vmem [shape: f32[512,16], index: 0, kind: input, shape index: {}]   ;;  %s837_s1 = inlined_call_operand.vmem [shape: bf16[16,48], index: 1, kind: input, shape index: {}]   ;;  %s838_s2 = inlined_call_operand.vmem [shape: f32[1,48], index: 2, kind: input, shape index: {}]   ;;  %s839_s3 = inlined_call_operand.vmem [shape: f32[512,48], index: 3, kind: output, shape index: {}]  }
   0x1 LB: > { %s537_s13 = sadd.s32 4294967295, %s634_s12   ;;  %p541_p0 = scmp.ge.s32.totalorder %s634_s12, 1  ;;  %s634_s12 = sphi %s656_s12, %s13_s12  }
   0x2   : > { %p138_p1 = scmp.lt.s32.totalorder %s634_s12, 3 }
   0x4   : > { %p139_p2 = pnand %p541_p0, %p138_p1 }
   0x5   : > { %s542_s16 = sshll.u32 (!%p139_p2), %s537_s13, 5 }
   0x6   : > { %142 = sbr.rel (%p139_p2) target bundleno = 245 (0xf5), region = 32  ;;  %p163_p3 = scmp.lt.s32.totalorder (!%p139_p2), %s542_s16, 63 }
   0xb   : > { %v627_v0 = vld [vmem:[%s837_s1] sm:$0xff]   ;;  %s841_s16 = smov (!%p163_p3, %s542_s16), 63  ;;  %vm238_vm0 = vcmask 130048   ;;  %vm448_vm1 = vcmask 392192  }
   0xc   : > { %583 = vmatprep.subr.bf16.mxu0 %v627_v0  ;;  %617 = vmatprep.subr.bf16.mxu1 %v627_v0  ;;  %s543_s17 = sshll.u32 %s841_s16, 3  ;;  %v728_v49 = vld [vmem:[%s838_s2] ss:$0 sm:$0xff] }
   0xd   : > { %584 = vmatpush3.bf16.msra.mxu0 %v627_v0  ;;  %618 = vmatpush3.bf16.msra.mxu1 %v627_v0  ;;  %s675_s20 = scalar_lea.vmem %s836_s0, %s543_s17  ;;  %s735_s25 = scalar_lea.vmem %s839_s3, %s543_s17 }
   0xe   : > { %v175_v1 = vld [vmem:[%s675_s20] sm:$0xff]  ;;  %v176_v2 = vld [vmem:[%s675_s20 + $0x8] sm:$0xff]  ;;  %v177_v6 = vld [vmem:[%s675_s20 + $0x10] sm:$0xff] }
   0xf   : > { %v191_v3 = vld [vmem:[%s675_s20 + $0x80] sm:$0xff]  ;;  %v207_v4 = vpack.c.bf16 %v176_v2, %v175_v1  ;;  %v192_v5 = vld [vmem:[%s675_s20 + $0x88] sm:$0xff]  ;;  %v178_v7 = vld [vmem:[%s675_s20 + $0x18] sm:$0xff] }
  0x10   : > { %v215_v8 = vpack.c.bf16 %v192_v5, %v191_v3  ;;  %v208_v9 = vpack.c.bf16 %v178_v7, %v177_v6  ;;  %v193_v10 = vld [vmem:[%s675_s20 + $0x90] sm:$0xff]  ;;  %v194_v11 = vld [vmem:[%s675_s20 + $0x98] sm:$0xff]  ;;  %v179_v12 = vld [vmem:[%s675_s20 + $0x20] sm:$0xff] }
  0x11   : > { %585 = vmatprep.mubr.msk.bf16.mxu0 %vm238_vm0, %v207_v4  ;;  %v216_v13 = vpack.c.bf16 %v194_v11, %v193_v10  ;;  %v180_v14 = vld [vmem:[%s675_s20 + $0x28] sm:$0xff]  ;;  %v195_v15 = vld [vmem:[%s675_s20 + $0xa0] sm:$0xff]  ;;  %v181_v19 = vld [vmem:[%s675_s20 + $0x30] sm:$0xff] }
  0x12   : > { %v196_v16 = vld [vmem:[%s675_s20 + $0xa8] sm:$0xff]  ;;  %601 = vmatprep.mubr.msk.bf16.mxu1 %vm238_vm0, %v215_v8  ;;  %586 = vmatmul.mubr.msk.bf16.vlgmr.msra.gmra.mxu0 %vm238_vm0, %v208_v9  ;;  %v209_v17 = vpack.c.bf16 %v180_v14, %v179_v12  ;;  %v182_v20 = vld [vmem:[%s675_s20 + $0x38] sm:$0xff]  ;;  %v197_v21 = vld [vmem:[%s675_s20 + $0xb0] sm:$0xff] }
  0x13   : > { %v217_v18 = vpack.c.bf16 %v196_v16, %v195_v15  ;;  %602 = vmatmul.mubr.msk.bf16.vlgmr.msra.gmra.mxu1 %vm238_vm0, %v216_v13  ;;  %v198_v22 = vld [vmem:[%s675_s20 + $0xb8] sm:$0xff]  ;;  %v183_v23 = vld [vmem:[%s675_s20 + $0x40] sm:$0xff]  ;;  %v184_v24 = vld [vmem:[%s675_s20 + $0x48] sm:$0xff]  ;;  %v210_v27 = vpack.c.bf16 %v182_v20, %v181_v19 }
  0x14   : > { %589 = vmatprep.mubr.msk.bf16.mxu0 %vm238_vm0, %v209_v17  ;;  %v199_v25 = vld [vmem:[%s675_s20 + $0xc0] sm:$0xff]  ;;  %v200_v26 = vld [vmem:[%s675_s20 + $0xc8] sm:$0xff]  ;;  %v218_v28 = vpack.c.bf16 %v198_v22, %v197_v21  ;;  %v211_v29 = vpack.c.bf16 %v184_v24, %v183_v23  ;;  %v185_v31 = vld [vmem:[%s675_s20 + $0x50] sm:$0xff] }
  0x15   : > { %605 = vmatprep.mubr.msk.bf16.mxu1 %vm238_vm0, %v217_v18  ;;  %v219_v30 = vpack.c.bf16 %v200_v26, %v199_v25  ;;  %v186_v32 = vld [vmem:[%s675_s20 + $0x58] sm:$0xff]  ;;  %v201_v33 = vld [vmem:[%s675_s20 + $0xd0] sm:$0xff]  ;;  %v187_v35 = vld [vmem:[%s675_s20 + $0x60] sm:$0xff] }
  0x16   : > { %v202_v34 = vld [vmem:[%s675_s20 + $0xd8] sm:$0xff]  ;;  %v188_v36 = vld [vmem:[%s675_s20 + $0x68] sm:$0xff]  ;;  %v203_v37 = vld [vmem:[%s675_s20 + $0xe0] sm:$0xff]  ;;  %v212_v39 = vpack.c.bf16 %v186_v32, %v185_v31 }
  0x17   : > { %v204_v38 = vld [vmem:[%s675_s20 + $0xe8] sm:$0xff]  ;;  %v220_v40 = vpack.c.bf16 %v202_v34, %v201_v33  ;;  %v213_v41 = vpack.c.bf16 %v188_v36, %v187_v35  ;;  %v189_v43 = vld [vmem:[%s675_s20 + $0x70] sm:$0xff]  ;;  %v190_v44 = vld [vmem:[%s675_s20 + $0x78] sm:$0xff] }
  0x18   : > { %v221_v42 = vpack.c.bf16 %v204_v38, %v203_v37  ;;  %v205_v45 = vld [vmem:[%s675_s20 + $0xf0] sm:$0xff]  ;;  %v206_v46 = vld [vmem:[%s675_s20 + $0xf8] sm:$0xff]  ;;  %v214_v47 = vpack.c.bf16 %v190_v44, %v189_v43 }
  0x19   : > { %v222_v48 = vpack.c.bf16 %v206_v46, %v205_v45 }
  0x1a   : > { %590 = vmatmul.mubr.msk.bf16.gmra.mxu0 %vm238_vm0, %v210_v27 }
  0x1b   : > { %606 = vmatmul.mubr.msk.bf16.gmra.mxu1 %vm238_vm0, %v218_v28  ;;  %593 = vmatprep.mubr.msk.bf16.mxu0 %vm238_vm0, %v211_v29 }
  0x1c   : > { %609 = vmatprep.mubr.msk.bf16.mxu1 %vm238_vm0, %v219_v30 }
  0x22   : > { %594 = vmatmul.mubr.msk.bf16.gmra.mxu0 %vm238_vm0, %v212_v39 }
  0x23   : > { %610 = vmatmul.mubr.msk.bf16.gmra.mxu1 %vm238_vm0, %v220_v40  ;;  %597 = vmatprep.mubr.msk.bf16.mxu0 %vm238_vm0, %v213_v41 }
  0x24   : > { %613 = vmatprep.mubr.msk.bf16.mxu1 %vm238_vm0, %v221_v42 }
  0x2a   : > { %598 = vmatmul.mubr.msk.bf16.gmra.mxu0 %vm238_vm0, %v214_v47 }
  0x2b   : > { %614 = vmatmul.mubr.msk.bf16.gmra.mxu1 %vm238_vm0, %v222_v48 }
  0xd2   : > { %v587_v50 = vpop.f32.mrf.mxu0 }
  0xd3   : > { %v330_v51 = vadd.f32 %v587_v50, %v728_v49  ;;  %v603_v52 = vpop.f32.mrf.mxu1 }
  0xd4   : > { %v394_v53 = vadd.f32 %v603_v52, %v728_v49  ;;  %v321_v54 = vpop.f32.mrf.mxu0 }
  0xd5   : > { %451 = vst.msk [vmem:[%s735_s25 + $0x10] sm:$0xff] %vm448_vm1, %v330_v51  ;;  %v322_v55 = vadd.f32 %v728_v49, %v321_v54  ;;  %v385_v56 = vpop.f32.mrf.mxu1 }
  0xd6   : > { %467 = vst.msk [vmem:[%s735_s25 + $0x90] sm:$0xff] %vm448_vm1, %v394_v53  ;;  %v386_v57 = vadd.f32 %v728_v49, %v385_v56  ;;  %v588_v58 = vpop.f32.mrf.mxu0 }
  0xd7   : > { %449 = vst.msk [vmem:[%s735_s25] sm:$0xff] %vm448_vm1, %v322_v55  ;;  %v333_v59 = vadd.f32 %v588_v58, %v728_v49  ;;  %v604_v60 = vpop.f32.mrf.mxu1 }
  0xd8   : > { %465 = vst.msk [vmem:[%s735_s25 + $0x80] sm:$0xff] %vm448_vm1, %v386_v57  ;;  %v397_v61 = vadd.f32 %v604_v60, %v728_v49  ;;  %v324_v62 = vpop.f32.mrf.mxu0 }
  0xd9   : > { %452 = vst.msk [vmem:[%s735_s25 + $0x18] sm:$0xff] %vm448_vm1, %v333_v59  ;;  %v325_v63 = vadd.f32 %v728_v49, %v324_v62  ;;  %v388_v0 = vpop.f32.mrf.mxu1 }
  0xda   : > { %468 = vst.msk [vmem:[%s735_s25 + $0x98] sm:$0xff] %vm448_vm1, %v397_v61  ;;  %v389_v1 = vadd.f32 %v728_v49, %v388_v0  ;;  %v591_v2 = vpop.f32.mrf.mxu0 }
  0xdb   : > { %450 = vst.msk [vmem:[%s735_s25 + $0x8] sm:$0xff] %vm448_vm1, %v325_v63  ;;  %v346_v3 = vadd.f32 %v591_v2, %v728_v49  ;;  %v607_v4 = vpop.f32.mrf.mxu1 }
  0xdc   : > { %466 = vst.msk [vmem:[%s735_s25 + $0x88] sm:$0xff] %vm448_vm1, %v389_v1  ;;  %v410_v5 = vadd.f32 %v607_v4, %v728_v49  ;;  %v337_v6 = vpop.f32.mrf.mxu0 }
  0xdd   : > { %455 = vst.msk [vmem:[%s735_s25 + $0x30] sm:$0xff] %vm448_vm1, %v346_v3  ;;  %v338_v7 = vadd.f32 %v728_v49, %v337_v6  ;;  %v401_v8 = vpop.f32.mrf.mxu1 }
  0xde   : > { %471 = vst.msk [vmem:[%s735_s25 + $0xb0] sm:$0xff] %vm448_vm1, %v410_v5  ;;  %v402_v9 = vadd.f32 %v728_v49, %v401_v8  ;;  %v592_v10 = vpop.f32.mrf.mxu0 }
  0xdf   : > { %453 = vst.msk [vmem:[%s735_s25 + $0x20] sm:$0xff] %vm448_vm1, %v338_v7  ;;  %v349_v11 = vadd.f32 %v592_v10, %v728_v49  ;;  %v608_v12 = vpop.f32.mrf.mxu1 }
  0xe0   : > { %469 = vst.msk [vmem:[%s735_s25 + $0xa0] sm:$0xff] %vm448_vm1, %v402_v9  ;;  %v413_v13 = vadd.f32 %v608_v12, %v728_v49  ;;  %v340_v14 = vpop.f32.mrf.mxu0 }
  0xe1   : > { %456 = vst.msk [vmem:[%s735_s25 + $0x38] sm:$0xff] %vm448_vm1, %v349_v11  ;;  %v341_v15 = vadd.f32 %v728_v49, %v340_v14  ;;  %v404_v16 = vpop.f32.mrf.mxu1 }
  0xe2   : > { %472 = vst.msk [vmem:[%s735_s25 + $0xb8] sm:$0xff] %vm448_vm1, %v413_v13  ;;  %v405_v17 = vadd.f32 %v728_v49, %v404_v16  ;;  %v595_v18 = vpop.f32.mrf.mxu0 }
  0xe3   : > { %454 = vst.msk [vmem:[%s735_s25 + $0x28] sm:$0xff] %vm448_vm1, %v341_v15  ;;  %v362_v19 = vadd.f32 %v595_v18, %v728_v49  ;;  %v611_v20 = vpop.f32.mrf.mxu1 }
  0xe4   : > { %470 = vst.msk [vmem:[%s735_s25 + $0xa8] sm:$0xff] %vm448_vm1, %v405_v17  ;;  %v426_v21 = vadd.f32 %v611_v20, %v728_v49  ;;  %v353_v22 = vpop.f32.mrf.mxu0 }
  0xe5   : > { %459 = vst.msk [vmem:[%s735_s25 + $0x50] sm:$0xff] %vm448_vm1, %v362_v19  ;;  %v354_v23 = vadd.f32 %v728_v49, %v353_v22  ;;  %v417_v24 = vpop.f32.mrf.mxu1 }
  0xe6   : > { %475 = vst.msk [vmem:[%s735_s25 + $0xd0] sm:$0xff] %vm448_vm1, %v426_v21  ;;  %v418_v25 = vadd.f32 %v728_v49, %v417_v24  ;;  %v596_v26 = vpop.f32.mrf.mxu0 }
  0xe7   : > { %457 = vst.msk [vmem:[%s735_s25 + $0x40] sm:$0xff] %vm448_vm1, %v354_v23  ;;  %v365_v27 = vadd.f32 %v596_v26, %v728_v49  ;;  %v612_v28 = vpop.f32.mrf.mxu1 }
  0xe8   : > { %473 = vst.msk [vmem:[%s735_s25 + $0xc0] sm:$0xff] %vm448_vm1, %v418_v25  ;;  %v429_v29 = vadd.f32 %v612_v28, %v728_v49  ;;  %v356_v30 = vpop.f32.mrf.mxu0 }
  0xe9   : > { %460 = vst.msk [vmem:[%s735_s25 + $0x58] sm:$0xff] %vm448_vm1, %v365_v27  ;;  %v357_v31 = vadd.f32 %v728_v49, %v356_v30  ;;  %v420_v32 = vpop.f32.mrf.mxu1 }
  0xea   : > { %476 = vst.msk [vmem:[%s735_s25 + $0xd8] sm:$0xff] %vm448_vm1, %v429_v29  ;;  %v421_v33 = vadd.f32 %v728_v49, %v420_v32  ;;  %v599_v34 = vpop.f32.mrf.mxu0 }
  0xeb   : > { %458 = vst.msk [vmem:[%s735_s25 + $0x48] sm:$0xff] %vm448_vm1, %v357_v31  ;;  %v378_v35 = vadd.f32 %v599_v34, %v728_v49  ;;  %v615_v36 = vpop.f32.mrf.mxu1 }
  0xec   : > { %474 = vst.msk [vmem:[%s735_s25 + $0xc8] sm:$0xff] %vm448_vm1, %v421_v33  ;;  %v442_v37 = vadd.f32 %v615_v36, %v728_v49  ;;  %v369_v38 = vpop.f32.mrf.mxu0 }
  0xed   : > { %463 = vst.msk [vmem:[%s735_s25 + $0x70] sm:$0xff] %vm448_vm1, %v378_v35  ;;  %v370_v39 = vadd.f32 %v728_v49, %v369_v38  ;;  %v433_v40 = vpop.f32.mrf.mxu1 }
  0xee   : > { %479 = vst.msk [vmem:[%s735_s25 + $0xf0] sm:$0xff] %vm448_vm1, %v442_v37  ;;  %v434_v41 = vadd.f32 %v728_v49, %v433_v40  ;;  %v600_v42 = vpop.f32.mrf.mxu0 }
  0xef   : > { %461 = vst.msk [vmem:[%s735_s25 + $0x60] sm:$0xff] %vm448_vm1, %v370_v39  ;;  %v381_v43 = vadd.f32 %v600_v42, %v728_v49  ;;  %v616_v44 = vpop.f32.mrf.mxu1 }
  0xf0   : > { %477 = vst.msk [vmem:[%s735_s25 + $0xe0] sm:$0xff] %vm448_vm1, %v434_v41  ;;  %v445_v45 = vadd.f32 %v616_v44, %v728_v49  ;;  %v372_v46 = vpop.f32.mrf.mxu0 }
  0xf1   : > { %464 = vst.msk [vmem:[%s735_s25 + $0x78] sm:$0xff] %vm448_vm1, %v381_v43  ;;  %v373_v47 = vadd.f32 %v728_v49, %v372_v46  ;;  %v436_v48 = vpop.f32.mrf.mxu1 }
  0xf2   : > { %480 = vst.msk [vmem:[%s735_s25 + $0xf8] sm:$0xff] %vm448_vm1, %v445_v45  ;;  %v437_v50 = vadd.f32 %v728_v49, %v436_v48 }
  0xf3   : > { %462 = vst.msk [vmem:[%s735_s25 + $0x68] sm:$0xff] %vm448_vm1, %v373_v47 }
  0xf4   : > { %478 = vst.msk [vmem:[%s735_s25 + $0xe8] sm:$0xff] %vm448_vm1, %v437_v50 }
  0xf5 PF: > { %s13_s12 = sadd.s32 1, %s634_s12  }
  0xf6   : > { %p10_p4 = scmp.ge.s32.totalorder %s13_s12, 4  }
  0xf8   :  { %12 = sbr.rel (!%p10_p4) target bundleno = 1 (0x1), region = 62 }

</bundles_post_ra>
